<compile_context>
chip_gen: v7x
topology: tpu7x:2x2x1
jax: 0.10.0
libtpu: 0.0.40
codegen_flags: <defaults>
</compile_context>

<pallas_src>
import math

import numpy as np
import jax
import jax.numpy as jnp
from jax.experimental import pallas as pl
from jax.experimental.pallas import tpu as pltpu

# ---- module hyper-parameters (from StateTracker_Caser.__init__) -------------
WINDOW = 10                                  # window_size
HIDDEN = 32                                  # action_columns[0].embedding_dim
NUM_FILTERS = 16                             # num_filters
FILTER_SIZES = (2, 3, 4)                     # filter_sizes
NUM_ITEM = 100                               # action_columns[0].vocabulary_size
NUM_FILTERS_TOTAL = NUM_FILTERS * len(FILTER_SIZES)     # 48
FINAL_DIM = NUM_FILTERS_TOTAL + HIDDEN                  # 80

# ---- fused lane-dense matmul layout -----------------------------------------
IN_FEATS = WINDOW * HIDDEN                   # 320 real input lanes
ONES_COL = IN_FEATS                          # constant-1.0 input lane (mask driver)
K_PAD = 384                                  # lane-padded contraction dim
N_BLK = 128                                  # lanes per window-position block
N_BLOCKS = WINDOW - min(FILTER_SIZES) + 1    # 9 valid positions (fs=2)
N_PAD = N_BLK * N_BLOCKS                     # 1152 matmul output lanes
OUT_PAD = 128                                # lane-dense output width
NEG = -1e9                                   # validity mask for max-pool
MAX_BATCH_TILE = 256                         # fits default scoped VMEM everywhere


def caser_kernel(x_ref, w_ref, bias_ref, out_ref):
    """One MXU matmul -> aligned 128-lane tree max -> bias + ReLU -> one store."""
    # [TB, 384] bf16 x [384, 1152] bf16 -> [TB, 1152] f32
    p = jnp.dot(x_ref[...], w_ref[...], preferred_element_type=jnp.float32)

    # max-pool over window positions: tree max over 128-lane-aligned blocks.
    # Invalid (position, lane) columns were baked to -1e9 via the constant lane.
    m = p[:, :N_BLK]
    for l in range(1, N_BLOCKS):
        m = jnp.maximum(m, p[:, l * N_BLK:(l + 1) * N_BLK])

    # relu(max(x) + b) == max(relu(x + b)) since relu and +b are monotone.
    # Single full-width (128-lane) unmasked store; pad lanes are exactly 0.
    out_ref[...] = jnp.maximum(m + bias_ref[...], 0.0)
    # TODO(synk): nn.Dropout is eval-mode identity here (no RNG mask applied).


def _choose_batch_tile(b):
    """>=2 grid steps when possible (v7x megacore), multiple of 8, VMEM-capped."""
    tb = (pl.cdiv(b, 2) + 7) // 8 * 8
    return max(8, min(MAX_BATCH_TILE, tb))


def caser_forward(emb_state, w_fused_bf16, bias_all):
    """emb_state [B, W, H] f32 -> state_hidden [B, FINAL_DIM] f32."""
    B = emb_state.shape[0]
    tb = _choose_batch_tile(B)
    b_pad = pl.cdiv(B, tb) * tb

    # lane-dense bf16 input slab: [B, 320] data | lane 320 = 1.0 | zero pad.
    x = emb_state.reshape(B, IN_FEATS).astype(jnp.bfloat16)
    x = jnp.concatenate(
        [x,
         jnp.ones((B, 1), jnp.bfloat16),
         jnp.zeros((B, K_PAD - IN_FEATS - 1), jnp.bfloat16)], axis=1)
    if b_pad != B:
        x = jnp.pad(x, ((0, b_pad - B), (0, 0)))

    cost = pl.CostEstimate(
        flops=2 * b_pad * K_PAD * N_PAD,
        transcendentals=0,
        bytes_accessed=(b_pad * K_PAD * 2 + K_PAD * N_PAD * 2
                        + OUT_PAD * 4 + b_pad * OUT_PAD * 4))

    out = pl.pallas_call(
        caser_kernel,
        out_shape=jax.ShapeDtypeStruct((b_pad, OUT_PAD), jnp.float32),
        grid=(b_pad // tb,),
        in_specs=[
            pl.BlockSpec((tb, K_PAD), lambda i: (i, 0)),
            pl.BlockSpec((K_PAD, N_PAD), lambda i: (0, 0)),
            pl.BlockSpec((1, OUT_PAD), lambda i: (0, 0)),
        ],
        out_specs=pl.BlockSpec((tb, OUT_PAD), lambda i: (i, 0)),
        compiler_params=pltpu.CompilerParams(
            dimension_semantics=("parallel",),
            vmem_limit_bytes=32 * 1024 * 1024),
        cost_estimate=cost,
    )(x, w_fused_bf16, bias_all)
    return out[:B, :FINAL_DIM]


def build_fused_weight(w_h, wv):
    """Pack all conv filters + validity mask into one [K_PAD, N_PAD] bf16 weight.

    Column block l (128 lanes, window position l = 0..8):
      lanes  0:16  -> filter_size 2 conv at position l
      lanes 16:32  -> filter_size 3 conv at position l
      lanes 32:48  -> filter_size 4 conv at position l
      lanes 48:80  -> vertical conv (block 0 only)
      lanes 80:128 -> zero pad
    Row ONES_COL (fed a constant 1.0) carries -1e9 on invalid (block, lane)
    columns so they never win the max-pool.
    """
    w = np.zeros((K_PAD, N_PAD), np.float32)
    for i, (wi, fs) in enumerate(zip(w_h, FILTER_SIZES)):       # wi: [fs, H, F]
        wi = np.asarray(wi)
        L = WINDOW - fs + 1
        for l in range(L):
            c = l * N_BLK + i * NUM_FILTERS
            for r in range(fs):
                w[(l + r) * HIDDEN:(l + r + 1) * HIDDEN,
                  c:c + NUM_FILTERS] = wi[r]
        for l in range(L, N_BLOCKS):                            # invalid positions
            c = l * N_BLK + i * NUM_FILTERS
            w[ONES_COL, c:c + NUM_FILTERS] = NEG

    wv_np = np.asarray(wv).reshape(WINDOW)
    eye = np.eye(HIDDEN, dtype=np.float32)
    for wpos in range(WINDOW):                                  # vertical conv, block 0
        w[wpos * HIDDEN:(wpos + 1) * HIDDEN,
          NUM_FILTERS_TOTAL:FINAL_DIM] += wv_np[wpos] * eye
    for l in range(1, N_BLOCKS):                                # vertical only in block 0
        w[ONES_COL, l * N_BLK + NUM_FILTERS_TOTAL:
          l * N_BLK + FINAL_DIM] = NEG
    return jnp.asarray(w).astype(jnp.bfloat16)


def xavier_normal(key, shape, fan_in, fan_out):
    std = math.sqrt(2.0 / (fan_in + fan_out))
    return std * jax.random.normal(key, shape, jnp.float32)


if __name__ == "__main__":
    key = jax.random.PRNGKey(0)
    k_emb, k_w2, k_w3, k_w4, k_wv, k_obs = jax.random.split(key, 6)

    # --- parameters (deterministic, matching __init__ shapes / inits) --------
    # Embedding(num_item + 1, hidden), normal(0, 0.1)
    emb_table = 0.1 * jax.random.normal(k_emb, (NUM_ITEM + 1, HIDDEN),
                                        jnp.float32)

    # horizontal convs: Conv2d(1, F, (fs, H)), xavier_normal weight, bias 0.1
    w_h = []
    for k_, fs in zip((k_w2, k_w3, k_w4), FILTER_SIZES):
        w = xavier_normal(k_, (NUM_FILTERS, 1, fs, HIDDEN),
                          fan_in=1 * fs * HIDDEN,
                          fan_out=NUM_FILTERS * fs * HIDDEN)
        # reorganize [F, 1, fs, H] -> [fs, H, F]
        w_h.append(jnp.transpose(w[:, 0, :, :], (1, 2, 0)))
    bh = jnp.full((len(FILTER_SIZES), NUM_FILTERS), 0.1, jnp.float32)

    # vertical conv: Conv2d(1, 1, (W, 1)), xavier_normal weight, bias 0.1
    wv_conv = xavier_normal(k_wv, (1, 1, WINDOW, 1),
                            fan_in=1 * WINDOW * 1, fan_out=1 * WINDOW * 1)
    wv = wv_conv.reshape(WINDOW, 1)
    bv = jnp.float32(0.1)

    # --- fuse everything into one lane-dense weight + packed f32 bias --------
    w_fused_bf16 = build_fused_weight(w_h, wv)
    bias_all = jnp.zeros((1, OUT_PAD), jnp.float32)
    bias_all = bias_all.at[0, :NUM_FILTERS_TOTAL].set(bh.reshape(-1))
    bias_all = bias_all.at[0, NUM_FILTERS_TOTAL:FINAL_DIM].set(bv)

    # --- emb_state via convert_to_k_state_embedding(reset=True) glue ---------
    B = 4
    obs = jax.random.randint(k_obs, (B, 2), 0, NUM_ITEM)       # [B, 2] user/item
    items = obs[:, 1]                                          # obs[:, 1]
    e_i = jnp.take(emb_table, items, axis=0)                   # [B, H]
    emb_state = jnp.tile(e_i[:, None, :], (1, WINDOW, 1))      # repeat_interleave
    mask = jnp.zeros((B, WINDOW, 1), jnp.float32).at[:, 0, :].set(1.0)
    emb_state = (emb_state * mask).astype(jnp.float32)         # [B, W, H]

    # --- run kernel -----------------------------------------------------------
    out = caser_forward(emb_state, w_fused_bf16, bias_all)
    out = jax.block_until_ready(out)

    # pure-JAX f32 reference (same math as the PyTorch module, no Pallas)
    ref_pool = []
    for w, fs in zip(w_h, FILTER_SIZES):
        L = WINDOW - fs + 1
        conv = sum(jnp.einsum('blh,hf->blf', emb_state[:, r:r + L, :], w[r])
                   for r in range(fs)) + 0.1
        ref_pool.append(jnp.max(jnp.maximum(conv, 0.0), axis=1))
    ref_v = jnp.maximum(jnp.sum(emb_state * wv[None, :, :], axis=1) + 0.1, 0.0)
    ref = jnp.concatenate(ref_pool + [ref_v], axis=1)

    assert out.shape == (B, FINAL_DIM)
    # MXU operands are bf16 (f32 accumulate), incl. the vertical conv ->
    # loosened tolerance vs the f32 reference.
    assert jnp.allclose(out, ref, atol=1e-2, rtol=1e-2), \
        float(jnp.max(jnp.abs(out - ref)))
    print("KERNEL_OK")
</pallas_src>

<mosaic_0001>
module attributes {stable_mosaic.version = 11 : i64} {
  func.func @caser_kernel(%arg0: i32, %arg1: memref<8x384xbf16, #tpu.memory_space<vmem>>, %arg2: memref<384x1152xbf16, #tpu.memory_space<vmem>>, %arg3: memref<1x128xf32, #tpu.memory_space<vmem>>, %arg4: memref<8x128xf32, #tpu.memory_space<vmem>>) attributes {dimension_semantics = [#tpu.dimension_semantics<parallel>], iteration_bounds = array<i64: 1>, scalar_prefetch = 0 : i64, scratch_operands = 0 : i64, tpu.core_type = #tpu.core_type<tc>, window_params = [{transform_indices = @transform_0, window_bounds = array<i64: 8, 384>}, {pipeline_mode = #tpu.pipeline_mode<synchronous>, transform_indices = @transform_1, window_bounds = array<i64: 384, 1152>}, {pipeline_mode = #tpu.pipeline_mode<synchronous>, transform_indices = @transform_2, window_bounds = array<i64: 1, 128>}, {transform_indices = @transform_3, window_bounds = array<i64: 8, 128>}]} {
    %c0 = arith.constant 0 : index
    %c0_0 = arith.constant 0 : index
    %0 = vector.load %arg1[%c0, %c0_0] : memref<8x384xbf16, #tpu.memory_space<vmem>>, vector<8x384xbf16>
    %c0_1 = arith.constant 0 : index
    %c0_2 = arith.constant 0 : index
    %1 = vector.load %arg2[%c0_1, %c0_2] : memref<384x1152xbf16, #tpu.memory_space<vmem>>, vector<384x1152xbf16>
    %cst = arith.constant dense<0.000000e+00> : vector<8x1152xf32>
    %2 = tpu.matmul %0, %1, %cst {dimension_numbers = #tpu.dot_dimension_numbers<[1], [0], [0], [1], [0, 0, 1, 1], [], []>} : vector<8x384xbf16>, vector<384x1152xbf16>, vector<8x1152xf32> -> vector<8x1152xf32>
    %3 = vector.extract_strided_slice %2 {offsets = [0, 0], sizes = [8, 128], strides = [1, 1]} : vector<8x1152xf32> to vector<8x128xf32>
    %4 = vector.extract_strided_slice %2 {offsets = [0, 128], sizes = [8, 128], strides = [1, 1]} : vector<8x1152xf32> to vector<8x128xf32>
    %5 = arith.maximumf %3, %4 : vector<8x128xf32>
    %6 = vector.extract_strided_slice %2 {offsets = [0, 256], sizes = [8, 128], strides = [1, 1]} : vector<8x1152xf32> to vector<8x128xf32>
    %7 = arith.maximumf %5, %6 : vector<8x128xf32>
    %8 = vector.extract_strided_slice %2 {offsets = [0, 384], sizes = [8, 128], strides = [1, 1]} : vector<8x1152xf32> to vector<8x128xf32>
    %9 = arith.maximumf %7, %8 : vector<8x128xf32>
    %10 = vector.extract_strided_slice %2 {offsets = [0, 512], sizes = [8, 128], strides = [1, 1]} : vector<8x1152xf32> to vector<8x128xf32>
    %11 = arith.maximumf %9, %10 : vector<8x128xf32>
    %12 = vector.extract_strided_slice %2 {offsets = [0, 640], sizes = [8, 128], strides = [1, 1]} : vector<8x1152xf32> to vector<8x128xf32>
    %13 = arith.maximumf %11, %12 : vector<8x128xf32>
    %14 = vector.extract_strided_slice %2 {offsets = [0, 768], sizes = [8, 128], strides = [1, 1]} : vector<8x1152xf32> to vector<8x128xf32>
    %15 = arith.maximumf %13, %14 : vector<8x128xf32>
    %16 = vector.extract_strided_slice %2 {offsets = [0, 896], sizes = [8, 128], strides = [1, 1]} : vector<8x1152xf32> to vector<8x128xf32>
    %17 = arith.maximumf %15, %16 : vector<8x128xf32>
    %18 = vector.extract_strided_slice %2 {offsets = [0, 1024], sizes = [8, 128], strides = [1, 1]} : vector<8x1152xf32> to vector<8x128xf32>
    %19 = arith.maximumf %17, %18 : vector<8x128xf32>
    %c0_3 = arith.constant 0 : index
    %c0_4 = arith.constant 0 : index
    %20 = vector.load %arg3[%c0_3, %c0_4] : memref<1x128xf32, #tpu.memory_space<vmem>>, vector<1x128xf32>
    %21 = vector.broadcast %20 : vector<1x128xf32> to vector<8x128xf32>
    %22 = arith.addf %19, %21 : vector<8x128xf32>
    %cst_5 = arith.constant 0.000000e+00 : f32
    %23 = vector.broadcast %cst_5 : f32 to vector<8x128xf32>
    %24 = arith.maximumf %22, %23 : vector<8x128xf32>
    %c0_6 = arith.constant 0 : index
    %c0_7 = arith.constant 0 : index
    %25 = vector.load %arg4[%c0_6, %c0_7] : memref<8x128xf32, #tpu.memory_space<vmem>>, vector<8x128xf32>
    tpu.vector_store %arg4[%c0_6, %c0_7], %24 {strides = array<i32>} : memref<8x128xf32, #tpu.memory_space<vmem>>, vector<8x128xf32>,
    return
  }
  func.func @transform_0(%arg0: i32) -> (i32, i32) {
    %c0_i32 = arith.constant 0 : i32
    %c0_i32_0 = arith.constant 0 : i32
    return %arg0, %c0_i32 : i32, i32
  }
  func.func @transform_1(%arg0: i32) -> (i32, i32) {
    %c0_i32 = arith.constant 0 : i32
    %c0_i32_0 = arith.constant 0 : i32
    %c0_i32_1 = arith.constant 0 : i32
    return %c0_i32, %c0_i32_0 : i32, i32
  }
  func.func @transform_2(%arg0: i32) -> (i32, i32) {
    %c0_i32 = arith.constant 0 : i32
    %c0_i32_0 = arith.constant 0 : i32
    %c0_i32_1 = arith.constant 0 : i32
    return %c0_i32, %c0_i32_0 : i32, i32
  }
  func.func @transform_3(%arg0: i32) -> (i32, i32) {
    %c0_i32 = arith.constant 0 : i32
    %c0_i32_0 = arith.constant 0 : i32
    return %arg0, %c0_i32 : i32, i32
  }
}

</mosaic_0001>

<bundles_post_ra>
// kernel: tpu_custom_call.1
= control target key start
LH: loop header
LB: loop body
LE: loop exit
PB: predicated region body
PF: predicated region fallthrough
CT: control target
= control target key end

     0   :  { %8 = vsyncpa [#allocation3], 0  ;;  %s2622_s0 = inlined_call_operand.hbm [shape: bf16[8,384], index: 0, kind: input, shape index: {}]   ;;  %s2623_s1 = inlined_call_operand.hbm [shape: bf16[384,1152], index: 1, kind: input, shape index: {}]   ;;  %s2624_s2 = inlined_call_operand.vmem [shape: f32[1,128], index: 2, kind: input, shape index: {}]   ;;  %s2625_s3 = inlined_call_operand.hbm [shape: f32[8,128], index: 3, kind: output, shape index: {}]  }
   0x1   :  { %9 = vsyncpa [#allocation6], 0 }
   0x2   :  { %10 = vsyncpa [#allocation4], 0  ;;  %s2523_s12 = smov [#allocation2]   ;;  %s2524_s14 = smov [#allocation5]  }
   0x3   :  { %s17_s13 = sshll.u32 %s2523_s12, 4  ;;  %s26_s15 = sshll.u32 %s2524_s14, 4  ;;  %s18_s13 = int_to_ptr.vmem [resolvable:$true] %s17_s13  ;;  %s2551_s15 = int_to_ptr.vmem [resolvable:$true] %s26_s15 }
   0x4   :  { %s2451_s18 = scalar_lea.hbm %s2622_s0, 192 }
   0x5   :  { %p2452_p0 = scmp.ne.s32.totalorder %s2622_s0, %s2451_s18  ;;  %p2455_p1 = scmp.lt.u32.totalorder %s2451_s18, %s2622_s0 }
   0x7   :  { %p2457_p2 = pnand %p2455_p1, %p2452_p0 }
   0x9   :  { %2460 = shalt.err (!%p2457_p2)
}
   0xa   :  { %s2461_s23 = scalar_lea.vmem %s18_s13, 192  ;;  %p2466_p4 = scmp.lt.s32.totalorder %s18_s13, %s18_s13 }
   0xb   :  { %p2462_p3 = scmp.ne.s32.totalorder %s18_s13, %s2461_s23  ;;  %p2467_p5 = scmp.lt.s32.totalorder %s2461_s23, %s2461_s23 }
   0xd   :  { %p2468_p6 = por %p2467_p5, %p2466_p4 }
   0xf   :  { %p2469_p7 = pnand %p2468_p6, %p2462_p3 }
  0x11   :  { %2472 = shalt.err (!%p2469_p7)
}
  0x12   :  { %20 = dma.hbm_to_vmem [thread:$0]  %s2622_s0, 192, %s18_s13, [#allocation3]  }
  0x13   :  { %s2473_s28 = scalar_lea.hbm %s2623_s1, 27648 }
  0x14   :  { %p2474_p8 = scmp.ne.s32.totalorder %s2623_s1, %s2473_s28  ;;  %p2477_p9 = scmp.lt.u32.totalorder %s2473_s28, %s2623_s1 }
  0x16   :  { %p2479_p10 = pnand %p2477_p9, %p2474_p8 }
  0x18   :  { %2482 = shalt.err (!%p2479_p10)
}
  0x19   :  { %s2483_s6 = scalar_lea.vmem %s2551_s15, 27648  ;;  %p2488_p12 = scmp.lt.s32.totalorder %s2551_s15, %s2551_s15 }
  0x1a   :  { %p2484_p11 = scmp.ne.s32.totalorder %s2551_s15, %s2483_s6  ;;  %p2489_p13 = scmp.lt.s32.totalorder %s2483_s6, %s2483_s6 }
  0x1c   :  { %p2490_p0 = por %p2489_p13, %p2488_p12 }
  0x1e   :  { %p2491_p1 = pnand %p2490_p0, %p2484_p11 }
  0x20   :  { %2494 = shalt.err (!%p2491_p1)
}
  0x21   :  { %s2525_s0 = smov 576   ;;  %s2526_s7 = smov 36  }
  0x22   :  { %32 = dma.hbm_to_vmem [thread:$0]  %s2623_s1, 27648, %s2551_s15, [#allocation6], %s2525_s0, %s2525_s0, %s2526_s7  }
  0x23   :  { %2517 = dma.done.wait [#allocation3], 192  }
  0x24   :  { %2518 = vsyncadd [#allocation3], 4294967104 }
  0x25   :  { %2519 = dma.done.wait [#allocation6], 27648  }
  0x26   :  { %2520 = vsyncadd [#allocation6], 4294939648  ;;  %v2136_v0 = vld [vmem:[#allocation5 + $0x4] ss:$36 sps:$4 sm:$0xff]   ;;  %v2138_v1 = vld [vmem:[#allocation5 + $0xc] ss:$36 sps:$4 sm:$0xff]  }
  0x27   :  { %1399 = vmatprep.subr.bf16.mxu0 %v2136_v0  ;;  %v2140_v2 = vld [vmem:[#allocation5] ss:$36 sps:$4 sm:$0xff]   ;;  %v2141_v3 = vld [vmem:[#allocation5 + $0x8] ss:$36 sps:$4 sm:$0xff]   ;;  %1481 = vmatprep.subr.bf16.mxu1 %v2138_v1  ;;  %v2144_v5 = vld [vmem:[#allocation5 + $0x54] ss:$36 sps:$4 sm:$0xff]  }
  0x28   :  { %v2142_v4 = vld [vmem:[#allocation5 + $0x4c] ss:$36 sps:$4 sm:$0xff]   ;;  %1400 = vmatpush1.bf16.msra.mxu0 %v2140_v2  ;;  %1482 = vmatpush1.bf16.msra.mxu1 %v2141_v3  ;;  %v2148_v8 = vld [vmem:[#allocation5 + $0x94] ss:$36 sps:$4 sm:$0xff]   ;;  %v2150_v9 = vld [vmem:[#allocation5 + $0x9c] ss:$36 sps:$4 sm:$0xff]  }
  0x29   :  { %v2146_v6 = vld [vmem:[#allocation5 + $0x48] ss:$36 sps:$4 sm:$0xff]   ;;  %1401 = vmatprep.subr.bf16.mxu0 %v2142_v4  ;;  %v2147_v7 = vld [vmem:[#allocation5 + $0x50] ss:$36 sps:$4 sm:$0xff]   ;;  %1483 = vmatprep.subr.bf16.mxu1 %v2144_v5  ;;  %v2153_v11 = vld [vmem:[#allocation5 + $0x98] ss:$36 sps:$4 sm:$0xff]  }
  0x2a   :  { %v2152_v10 = vld [vmem:[#allocation5 + $0x90] ss:$36 sps:$4 sm:$0xff]   ;;  %v2154_v12 = vld [vmem:[#allocation5 + $0xdc] ss:$36 sps:$4 sm:$0xff]   ;;  %v2156_v13 = vld [vmem:[#allocation5 + $0xe4] ss:$36 sps:$4 sm:$0xff]  }
  0x2b   :  { %v2158_v14 = vld [vmem:[#allocation5 + $0xd8] ss:$36 sps:$4 sm:$0xff]   ;;  %v2159_v15 = vld [vmem:[#allocation5 + $0xe0] ss:$36 sps:$4 sm:$0xff]   ;;  %v2162_v17 = vld [vmem:[#allocation5 + $0x12c] ss:$36 sps:$4 sm:$0xff]  }
  0x2c   :  { %1402 = vmatpush1.bf16.msra.mxu0 %v2146_v6  ;;  %1484 = vmatpush1.bf16.msra.mxu1 %v2147_v7  ;;  %v2160_v16 = vld [vmem:[#allocation5 + $0x124] ss:$36 sps:$4 sm:$0xff]   ;;  %v2166_v20 = vld [vmem:[#allocation5 + $0x16c] ss:$36 sps:$4 sm:$0xff]   ;;  %v2168_v21 = vld [vmem:[#allocation5 + $0x174] ss:$36 sps:$4 sm:$0xff]  }
  0x2d   :  { %1403 = vmatprep.subr.bf16.mxu0 %v2148_v8  ;;  %1485 = vmatprep.subr.bf16.mxu1 %v2150_v9  ;;  %v2164_v18 = vld [vmem:[#allocation5 + $0x120] ss:$36 sps:$4 sm:$0xff]   ;;  %v2165_v19 = vld [vmem:[#allocation5 + $0x128] ss:$36 sps:$4 sm:$0xff]   ;;  %v2171_v23 = vld [vmem:[#allocation5 + $0x170] ss:$36 sps:$4 sm:$0xff]  }
  0x2e   :  { %v2170_v22 = vld [vmem:[#allocation5 + $0x168] ss:$36 sps:$4 sm:$0xff]   ;;  %v2172_v24 = vld [vmem:[#allocation5 + $0x1b4] ss:$36 sps:$4 sm:$0xff]   ;;  %v2174_v25 = vld [vmem:[#allocation5 + $0x1bc] ss:$36 sps:$4 sm:$0xff]  }
  0x2f   :  { %v2176_v26 = vld [vmem:[#allocation5 + $0x1b0] ss:$36 sps:$4 sm:$0xff]   ;;  %v2177_v27 = vld [vmem:[#allocation5 + $0x1b8] ss:$36 sps:$4 sm:$0xff]   ;;  %v2180_v29 = vld [vmem:[#allocation5 + $0x204] ss:$36 sps:$4 sm:$0xff]  }
  0x30   :  { %1404 = vmatpush1.bf16.msra.mxu0 %v2152_v10  ;;  %1486 = vmatpush1.bf16.msra.mxu1 %v2153_v11  ;;  %v2178_v28 = vld [vmem:[#allocation5 + $0x1fc] ss:$36 sps:$4 sm:$0xff]   ;;  %v2184_v32 = vld [vmem:[#allocation5 + $0x244] ss:$36 sps:$4 sm:$0xff]   ;;  %v2186_v33 = vld [vmem:[#allocation5 + $0x24c] ss:$36 sps:$4 sm:$0xff]  }
  0x31   :  { %1405 = vmatprep.subr.bf16.mxu0 %v2154_v12  ;;  %1487 = vmatprep.subr.bf16.mxu1 %v2156_v13  ;;  %v2182_v30 = vld [vmem:[#allocation5 + $0x1f8] ss:$36 sps:$4 sm:$0xff]   ;;  %v2183_v31 = vld [vmem:[#allocation5 + $0x200] ss:$36 sps:$4 sm:$0xff]   ;;  %v2189_v35 = vld [vmem:[#allocation5 + $0x248] ss:$36 sps:$4 sm:$0xff]  }
  0x32   :  { %v2188_v34 = vld [vmem:[#allocation5 + $0x240] ss:$36 sps:$4 sm:$0xff]   ;;  %v2190_v36 = vld [vmem:[#allocation5 + $0x28c] ss:$36 sps:$4 sm:$0xff]   ;;  %v2192_v37 = vld [vmem:[#allocation5 + $0x294] ss:$36 sps:$4 sm:$0xff]  }
  0x33   :  { %v2194_v38 = vld [vmem:[#allocation5 + $0x288] ss:$36 sps:$4 sm:$0xff]   ;;  %v2195_v39 = vld [vmem:[#allocation5 + $0x290] ss:$36 sps:$4 sm:$0xff]   ;;  %v2198_v41 = vld [vmem:[#allocation5 + $0x2dc] ss:$36 sps:$4 sm:$0xff]  }
  0x34   :  { %1406 = vmatpush1.bf16.msra.mxu0 %v2158_v14  ;;  %1488 = vmatpush1.bf16.msra.mxu1 %v2159_v15  ;;  %v2196_v40 = vld [vmem:[#allocation5 + $0x2d4] ss:$36 sps:$4 sm:$0xff]   ;;  %v2202_v44 = vld [vmem:[#allocation5 + $0x31c] ss:$36 sps:$4 sm:$0xff]   ;;  %v2204_v45 = vld [vmem:[#allocation5 + $0x324] ss:$36 sps:$4 sm:$0xff]  }
  0x35   :  { %1407 = vmatprep.subr.bf16.mxu0 %v2160_v16  ;;  %1489 = vmatprep.subr.bf16.mxu1 %v2162_v17  ;;  %v2200_v42 = vld [vmem:[#allocation5 + $0x2d0] ss:$36 sps:$4 sm:$0xff]   ;;  %v2201_v43 = vld [vmem:[#allocation5 + $0x2d8] ss:$36 sps:$4 sm:$0xff]   ;;  %v2207_v49 = vld [vmem:[#allocation5 + $0x320] ss:$36 sps:$4 sm:$0xff]  }
  0x36   :  { %v42_v46 = vld [vmem:[#allocation2] sm:$0xff]  ;;  %v2208_v50 = vld [vmem:[#allocation5 + $0x364] ss:$36 sps:$4 sm:$0xff]   ;;  %v2210_v51 = vld [vmem:[#allocation5 + $0x36c] ss:$36 sps:$4 sm:$0xff]   ;;  %v2527_v13 = vmov 0  }
  0x37   :  { %v2206_v47 = vld [vmem:[#allocation5 + $0x318] ss:$36 sps:$4 sm:$0xff]   ;;  %v2582_v48 = vcombine.high %v42_v46, %v42_v46  ;;  %v2212_v52 = vld [vmem:[#allocation5 + $0x360] ss:$36 sps:$4 sm:$0xff]   ;;  %v2213_v53 = vld [vmem:[#allocation5 + $0x368] ss:$36 sps:$4 sm:$0xff]   ;;  %v2586_v5 = vcombine.low %v42_v46, %v42_v46 }
  0x38   :  { %1408 = vmatpush1.bf16.msra.mxu0 %v2164_v18  ;;  %1490 = vmatpush1.bf16.msra.mxu1 %v2165_v19  ;;  %v2214_v54 = vld [vmem:[#allocation5 + $0x3ac] ss:$36 sps:$4 sm:$0xff]   ;;  %v2216_v55 = vld [vmem:[#allocation5 + $0x3b4] ss:$36 sps:$4 sm:$0xff]   ;;  %v2222_v59 = vld [vmem:[#allocation5 + $0x3fc] ss:$36 sps:$4 sm:$0xff]  }
  0x39   :  { %1409 = vmatprep.subr.bf16.mxu0 %v2166_v20  ;;  %1491 = vmatprep.subr.bf16.mxu1 %v2168_v21  ;;  %v2218_v56 = vld [vmem:[#allocation5 + $0x3a8] ss:$36 sps:$4 sm:$0xff]   ;;  %v2219_v57 = vld [vmem:[#allocation5 + $0x3b0] ss:$36 sps:$4 sm:$0xff]   ;;  %v2225_v61 = vld [vmem:[#allocation5 + $0x3f8] ss:$36 sps:$4 sm:$0xff]  }
  0x3a   :  { %1431 = vmatprep.mubr.bf16.mxu0 %v2582_v48  ;;  %1513 = vmatprep.mubr.bf16.mxu1 %v2582_v48  ;;  %v2220_v58 = vld [vmem:[#allocation5 + $0x3f4] ss:$36 sps:$4 sm:$0xff]   ;;  %v2226_v62 = vld [vmem:[#allocation5 + $0x43c] ss:$36 sps:$4 sm:$0xff]   ;;  %v2228_v63 = vld [vmem:[#allocation5 + $0x444] ss:$36 sps:$4 sm:$0xff]  }
  0x3b   :  { %v2224_v60 = vld [vmem:[#allocation5 + $0x3f0] ss:$36 sps:$4 sm:$0xff]   ;;  %v2230_v0 = vld [vmem:[#allocation5 + $0x438] ss:$36 sps:$4 sm:$0xff]   ;;  %v2231_v1 = vld [vmem:[#allocation5 + $0x440] ss:$36 sps:$4 sm:$0xff]  }
  0x3c   :  { %1410 = vmatpush1.bf16.msra.mxu0 %v2170_v22  ;;  %1492 = vmatpush1.bf16.msra.mxu1 %v2171_v23  ;;  %v2235_v2 = vld [vmem:[#allocation5 + $0x484] ss:$36 sps:$4 sm:$0xff]   ;;  %v2238_v3 = vld [vmem:[#allocation5 + $0x48c] ss:$36 sps:$4 sm:$0xff]   ;;  %v2245_v8 = vld [vmem:[#allocation5 + $0x4d4] ss:$36 sps:$4 sm:$0xff]  }
  0x3d   :  { %1411 = vmatprep.subr.bf16.mxu0 %v2172_v24  ;;  %1493 = vmatprep.subr.bf16.mxu1 %v2174_v25  ;;  %v2233_v4 = vld [vmem:[#allocation5 + $0x480] ss:$36 sps:$4 sm:$0xff]   ;;  %v2236_v6 = vld [vmem:[#allocation5 + $0x488] ss:$36 sps:$4 sm:$0xff]   ;;  %v2243_v10 = vld [vmem:[#allocation5 + $0x4d0] ss:$36 sps:$4 sm:$0xff]  }
  0x3e   :  { %v2242_v7 = vld [vmem:[#allocation5 + $0x4cc] ss:$36 sps:$4 sm:$0xff]   ;;  %v2248_v11 = vld [vmem:[#allocation5 + $0x514] ss:$36 sps:$4 sm:$0xff]   ;;  %v2251_v12 = vld [vmem:[#allocation5 + $0x51c] ss:$36 sps:$4 sm:$0xff]  }
  0x3f   :  { %v2240_v9 = vld [vmem:[#allocation5 + $0x4c8] ss:$36 sps:$4 sm:$0xff]   ;;  %v2246_v14 = vld [vmem:[#allocation5 + $0x510] ss:$36 sps:$4 sm:$0xff]   ;;  %v2249_v15 = vld [vmem:[#allocation5 + $0x518] ss:$36 sps:$4 sm:$0xff]  }
  0x40   :  { %1412 = vmatpush1.bf16.msra.mxu0 %v2176_v26  ;;  %1494 = vmatpush1.bf16.msra.mxu1 %v2177_v27  ;;  %v2254_v16 = vld [vmem:[#allocation5 + $0x55c] ss:$36 sps:$4 sm:$0xff]   ;;  %v2257_v17 = vld [vmem:[#allocation5 + $0x564] ss:$36 sps:$4 sm:$0xff]   ;;  %v2263_v21 = vld [vmem:[#allocation5 + $0x5ac] ss:$36 sps:$4 sm:$0xff]  }
  0x41   :  { %1413 = vmatprep.subr.bf16.mxu0 %v2178_v28  ;;  %1495 = vmatprep.subr.bf16.mxu1 %v2180_v29  ;;  %v2252_v18 = vld [vmem:[#allocation5 + $0x558] ss:$36 sps:$4 sm:$0xff]   ;;  %v2255_v19 = vld [vmem:[#allocation5 + $0x560] ss:$36 sps:$4 sm:$0xff]   ;;  %v2261_v23 = vld [vmem:[#allocation5 + $0x5a8] ss:$36 sps:$4 sm:$0xff]  }
  0x42   :  { %v2260_v20 = vld [vmem:[#allocation5 + $0x5a4] ss:$36 sps:$4 sm:$0xff]   ;;  %v2266_v24 = vld [vmem:[#allocation5 + $0x5ec] ss:$36 sps:$4 sm:$0xff]   ;;  %v2269_v25 = vld [vmem:[#allocation5 + $0x5f4] ss:$36 sps:$4 sm:$0xff]  }
  0x43   :  { %v2258_v22 = vld [vmem:[#allocation5 + $0x5a0] ss:$36 sps:$4 sm:$0xff]   ;;  %v2264_v26 = vld [vmem:[#allocation5 + $0x5e8] ss:$36 sps:$4 sm:$0xff]   ;;  %v2267_v27 = vld [vmem:[#allocation5 + $0x5f0] ss:$36 sps:$4 sm:$0xff]  }
  0x44   :  { %1414 = vmatpush1.bf16.msra.mxu0 %v2182_v30  ;;  %1496 = vmatpush1.bf16.msra.mxu1 %v2183_v31  ;;  %v2272_v28 = vld [vmem:[#allocation5 + $0x634] ss:$36 sps:$4 sm:$0xff]   ;;  %v2275_v29 = vld [vmem:[#allocation5 + $0x63c] ss:$36 sps:$4 sm:$0xff]   ;;  %v2300_v46 = vld [vmem:[#allocation5 + $0xac] ss:$36 sps:$4 sm:$0xff]  }
  0x45   :  { %1415 = vmatprep.subr.bf16.mxu0 %v2184_v32  ;;  %1497 = vmatprep.subr.bf16.mxu1 %v2186_v33  ;;  %v2270_v30 = vld [vmem:[#allocation5 + $0x630] ss:$36 sps:$4 sm:$0xff]   ;;  %v2273_v31 = vld [vmem:[#allocation5 + $0x638] ss:$36 sps:$4 sm:$0xff]   ;;  %v2281_v33 = vld [vmem:[#allocation5 + $0x684] ss:$36 sps:$4 sm:$0xff]  }
  0x46   :  { %v2278_v32 = vld [vmem:[#allocation5 + $0x67c] ss:$36 sps:$4 sm:$0xff]   ;;  %vm2529_vm0 = vmmov 0   ;;  %s2530_s11 = smov [#allocation7]  }
  0x47   :  { %s1831_s12 = sshll.u32 %s2530_s11, 4  ;;  %s1832_s12 = int_to_ptr.vmem [resolvable:$true] %s1831_s12 }
  0x48   :  { %1416 = vmatpush1.bf16.msra.mxu0 %v2188_v34  ;;  %1498 = vmatpush1.bf16.msra.mxu1 %v2189_v35  ;;  %v2276_v34 = vld [vmem:[#allocation5 + $0x678] ss:$36 sps:$4 sm:$0xff]   ;;  %v2279_v35 = vld [vmem:[#allocation5 + $0x680] ss:$36 sps:$4 sm:$0xff]   ;;  %s2495_s13 = scalar_lea.vmem %s1832_s12, 128  ;;  %p2500_p3 = scmp.lt.s32.totalorder %s1832_s12, %s1832_s12 }
  0x49   :  { %1417 = vmatprep.subr.bf16.mxu0 %v2190_v36  ;;  %1499 = vmatprep.subr.bf16.mxu1 %v2192_v37  ;;  %v2285_v36 = vld [vmem:[#allocation5 + $0x14] ss:$36 sps:$4 sm:$0xff]   ;;  %v2288_v37 = vld [vmem:[#allocation5 + $0x1c] ss:$36 sps:$4 sm:$0xff]   ;;  %p2496_p2 = scmp.ne.s32.totalorder %s1832_s12, %s2495_s13  ;;  %p2501_p4 = scmp.lt.s32.totalorder %s2495_s13, %s2495_s13 }
  0x4b   :  { %p2502_p5 = por %p2501_p4, %p2500_p3 }
  0x4c   :  { %1418 = vmatpush1.bf16.msra.mxu0 %v2194_v38  ;;  %1500 = vmatpush1.bf16.msra.mxu1 %v2195_v39  ;;  %v2592_v38 = vld [vmem:[#allocation2 + $0x8] ss:$0 sps:$4 sm:$0xff]   ;;  %v2283_v39 = vld [vmem:[#allocation5 + $0x10] ss:$36 sps:$4 sm:$0xff]  }
  0x4d   :  { %1419 = vmatprep.subr.bf16.mxu0 %v2196_v40  ;;  %1501 = vmatprep.subr.bf16.mxu1 %v2198_v41  ;;  %v2286_v40 = vld [vmem:[#allocation5 + $0x18] ss:$36 sps:$4 sm:$0xff]   ;;  %p2503_p6 = pnand %p2502_p5, %p2496_p2 }
  0x4e   :  { %v2291_v41 = vld [vmem:[#allocation5 + $0x5c] ss:$36 sps:$4 sm:$0xff]  }
  0x50   :  { %1420 = vmatpush1.bf16.msra.mxu0 %v2200_v42  ;;  %1502 = vmatpush1.bf16.msra.mxu1 %v2201_v43  ;;  %v2294_v42 = vld [vmem:[#allocation5 + $0x64] ss:$36 sps:$4 sm:$0xff]   ;;  %v2289_v43 = vld [vmem:[#allocation5 + $0x58] ss:$36 sps:$4 sm:$0xff]  }
  0x51   :  { %1421 = vmatprep.subr.bf16.mxu0 %v2202_v44  ;;  %1503 = vmatprep.subr.bf16.mxu1 %v2204_v45  ;;  %v2292_v44 = vld [vmem:[#allocation5 + $0x60] ss:$36 sps:$4 sm:$0xff]  }
  0x52   :  { %v2297_v45 = vld [vmem:[#allocation5 + $0xa4] ss:$36 sps:$4 sm:$0xff]  }
  0x54   :  { %1422 = vmatpush1.bf16.msra.mxu0 %v2206_v47  ;;  %1504 = vmatpush1.bf16.msra.mxu1 %v2207_v49  ;;  %v2295_v47 = vld [vmem:[#allocation5 + $0xa0] ss:$36 sps:$4 sm:$0xff]   ;;  %v2298_v49 = vld [vmem:[#allocation5 + $0xa8] ss:$36 sps:$4 sm:$0xff]  }
  0x55   :  { %1423 = vmatprep.subr.bf16.mxu0 %v2208_v50  ;;  %1505 = vmatprep.subr.bf16.mxu1 %v2210_v51  ;;  %v2303_v50 = vld [vmem:[#allocation5 + $0xec] ss:$36 sps:$4 sm:$0xff]   ;;  %v2306_v51 = vld [vmem:[#allocation5 + $0xf4] ss:$36 sps:$4 sm:$0xff]  }
  0x58   :  { %1424 = vmatpush1.bf16.msra.mxu0 %v2212_v52  ;;  %1506 = vmatpush1.bf16.msra.mxu1 %v2213_v53  ;;  %v2301_v52 = vld [vmem:[#allocation5 + $0xe8] ss:$36 sps:$4 sm:$0xff]   ;;  %v2304_v53 = vld [vmem:[#allocation5 + $0xf0] ss:$36 sps:$4 sm:$0xff]  }
  0x59   :  { %1425 = vmatprep.subr.bf16.mxu0 %v2214_v54  ;;  %1507 = vmatprep.subr.bf16.mxu1 %v2216_v55  ;;  %v2309_v54 = vld [vmem:[#allocation5 + $0x134] ss:$36 sps:$4 sm:$0xff]   ;;  %v2312_v55 = vld [vmem:[#allocation5 + $0x13c] ss:$36 sps:$4 sm:$0xff]  }
  0x5c   :  { %1426 = vmatpush1.bf16.msra.mxu0 %v2218_v56  ;;  %1508 = vmatpush1.bf16.msra.mxu1 %v2219_v57  ;;  %v2307_v56 = vld [vmem:[#allocation5 + $0x130] ss:$36 sps:$4 sm:$0xff]   ;;  %v2310_v57 = vld [vmem:[#allocation5 + $0x138] ss:$36 sps:$4 sm:$0xff]  }
  0x5d   :  { %1427 = vmatprep.subr.bf16.mxu0 %v2220_v58  ;;  %1509 = vmatprep.subr.bf16.mxu1 %v2222_v59  ;;  %v2315_v58 = vld [vmem:[#allocation5 + $0x17c] ss:$36 sps:$4 sm:$0xff]   ;;  %v2318_v59 = vld [vmem:[#allocation5 + $0x184] ss:$36 sps:$4 sm:$0xff]  }
  0x60   :  { %1428 = vmatpush1.bf16.msra.mxu0 %v2224_v60  ;;  %1510 = vmatpush1.bf16.msra.mxu1 %v2225_v61  ;;  %v2313_v60 = vld [vmem:[#allocation5 + $0x178] ss:$36 sps:$4 sm:$0xff]   ;;  %v2316_v61 = vld [vmem:[#allocation5 + $0x180] ss:$36 sps:$4 sm:$0xff]  }
  0x61   :  { %1429 = vmatprep.subr.bf16.mxu0 %v2226_v62  ;;  %1511 = vmatprep.subr.bf16.mxu1 %v2228_v63  ;;  %v2321_v62 = vld [vmem:[#allocation5 + $0x1c4] ss:$36 sps:$4 sm:$0xff]   ;;  %v2324_v63 = vld [vmem:[#allocation5 + $0x1cc] ss:$36 sps:$4 sm:$0xff]  }
  0x64   :  { %1430 = vmatpush1.bf16.msra.mxu0 %v2230_v0  ;;  %1512 = vmatpush1.bf16.msra.mxu1 %v2231_v1  ;;  %v2319_v0 = vld [vmem:[#allocation5 + $0x1c0] ss:$36 sps:$4 sm:$0xff]   ;;  %v2322_v1 = vld [vmem:[#allocation5 + $0x1c8] ss:$36 sps:$4 sm:$0xff]  }
  0x65   :  { %1440 = vmatprep.subr.bf16.mxu0 %v2235_v2  ;;  %1522 = vmatprep.subr.bf16.mxu1 %v2238_v3  ;;  %v2327_v2 = vld [vmem:[#allocation5 + $0x20c] ss:$36 sps:$4 sm:$0xff]   ;;  %v2330_v3 = vld [vmem:[#allocation5 + $0x214] ss:$36 sps:$4 sm:$0xff]  }
  0x67   :  { %1432 = vmatmul.mubr.bf16.vlgmr.msra.gmra.mrb[0].mxu0 %v2586_v5  ;;  %1514 = vmatmul.mubr.bf16.vlgmr.msra.gmra.mrb[0].mxu1 %v2586_v5 }
  0x68   :  { %1441 = vmatpush1.bf16.msra.mxu0 %v2233_v4  ;;  %1523 = vmatpush1.bf16.msra.mxu1 %v2236_v6  ;;  %v2325_v4 = vld [vmem:[#allocation5 + $0x208] ss:$36 sps:$4 sm:$0xff]   ;;  %v2328_v6 = vld [vmem:[#allocation5 + $0x210] ss:$36 sps:$4 sm:$0xff]  }
  0x69   :  { %1442 = vmatprep.subr.bf16.mxu0 %v2242_v7  ;;  %1524 = vmatprep.subr.bf16.mxu1 %v2245_v8  ;;  %v2333_v7 = vld [vmem:[#allocation5 + $0x254] ss:$36 sps:$4 sm:$0xff]   ;;  %v2336_v8 = vld [vmem:[#allocation5 + $0x25c] ss:$36 sps:$4 sm:$0xff]  }
  0x6a   :  { %1472 = vmatprep.mubr.bf16.mxu0 %v2527_v13  ;;  %1554 = vmatprep.mubr.bf16.mxu1 %v2527_v13 }
  0x6c   :  { %1443 = vmatpush1.bf16.msra.mxu0 %v2240_v9  ;;  %1525 = vmatpush1.bf16.msra.mxu1 %v2243_v10  ;;  %v2331_v9 = vld [vmem:[#allocation5 + $0x250] ss:$36 sps:$4 sm:$0xff]   ;;  %v2334_v10 = vld [vmem:[#allocation5 + $0x258] ss:$36 sps:$4 sm:$0xff]  }
  0x6d   :  { %1444 = vmatprep.subr.bf16.mxu0 %v2248_v11  ;;  %1526 = vmatprep.subr.bf16.mxu1 %v2251_v12  ;;  %v2339_v11 = vld [vmem:[#allocation5 + $0x29c] ss:$36 sps:$4 sm:$0xff]   ;;  %v2342_v12 = vld [vmem:[#allocation5 + $0x2a4] ss:$36 sps:$4 sm:$0xff]  }
  0x70   :  { %1445 = vmatpush1.bf16.msra.mxu0 %v2246_v14  ;;  %1527 = vmatpush1.bf16.msra.mxu1 %v2249_v15  ;;  %v2337_v14 = vld [vmem:[#allocation5 + $0x298] ss:$36 sps:$4 sm:$0xff]   ;;  %v2340_v15 = vld [vmem:[#allocation5 + $0x2a0] ss:$36 sps:$4 sm:$0xff]  }
  0x71   :  { %1446 = vmatprep.subr.bf16.mxu0 %v2254_v16  ;;  %1528 = vmatprep.subr.bf16.mxu1 %v2257_v17  ;;  %v2345_v16 = vld [vmem:[#allocation5 + $0x2e4] ss:$36 sps:$4 sm:$0xff]   ;;  %v2348_v17 = vld [vmem:[#allocation5 + $0x2ec] ss:$36 sps:$4 sm:$0xff]  }
  0x74   :  { %1447 = vmatpush1.bf16.msra.mxu0 %v2252_v18  ;;  %1529 = vmatpush1.bf16.msra.mxu1 %v2255_v19  ;;  %v2343_v18 = vld [vmem:[#allocation5 + $0x2e0] ss:$36 sps:$4 sm:$0xff]   ;;  %v2346_v19 = vld [vmem:[#allocation5 + $0x2e8] ss:$36 sps:$4 sm:$0xff]  }
  0x75   :  { %1448 = vmatprep.subr.bf16.mxu0 %v2260_v20  ;;  %1530 = vmatprep.subr.bf16.mxu1 %v2263_v21  ;;  %v2351_v20 = vld [vmem:[#allocation5 + $0x32c] ss:$36 sps:$4 sm:$0xff]   ;;  %v2354_v21 = vld [vmem:[#allocation5 + $0x334] ss:$36 sps:$4 sm:$0xff]  }
  0x78   :  { %1449 = vmatpush1.bf16.msra.mxu0 %v2258_v22  ;;  %1531 = vmatpush1.bf16.msra.mxu1 %v2261_v23  ;;  %v2349_v22 = vld [vmem:[#allocation5 + $0x328] ss:$36 sps:$4 sm:$0xff]   ;;  %v2352_v23 = vld [vmem:[#allocation5 + $0x330] ss:$36 sps:$4 sm:$0xff]  }
  0x79   :  { %1450 = vmatprep.subr.bf16.mxu0 %v2266_v24  ;;  %1532 = vmatprep.subr.bf16.mxu1 %v2269_v25  ;;  %v2357_v24 = vld [vmem:[#allocation5 + $0x374] ss:$36 sps:$4 sm:$0xff]   ;;  %v2360_v25 = vld [vmem:[#allocation5 + $0x37c] ss:$36 sps:$4 sm:$0xff]  }
  0x7c   :  { %1451 = vmatpush1.bf16.msra.mxu0 %v2264_v26  ;;  %1533 = vmatpush1.bf16.msra.mxu1 %v2267_v27  ;;  %v2355_v26 = vld [vmem:[#allocation5 + $0x370] ss:$36 sps:$4 sm:$0xff]   ;;  %v2358_v27 = vld [vmem:[#allocation5 + $0x378] ss:$36 sps:$4 sm:$0xff]  }
  0x7d   :  { %1452 = vmatprep.subr.bf16.mxu0 %v2272_v28  ;;  %1534 = vmatprep.subr.bf16.mxu1 %v2275_v29  ;;  %v2363_v28 = vld [vmem:[#allocation5 + $0x3bc] ss:$36 sps:$4 sm:$0xff]   ;;  %v2366_v29 = vld [vmem:[#allocation5 + $0x3c4] ss:$36 sps:$4 sm:$0xff]  }
  0x80   :  { %1453 = vmatpush1.bf16.msra.mxu0 %v2270_v30  ;;  %1535 = vmatpush1.bf16.msra.mxu1 %v2273_v31  ;;  %v2361_v30 = vld [vmem:[#allocation5 + $0x3b8] ss:$36 sps:$4 sm:$0xff]   ;;  %v2364_v31 = vld [vmem:[#allocation5 + $0x3c0] ss:$36 sps:$4 sm:$0xff]  }
  0x81   :  { %1454 = vmatprep.subr.bf16.mxu0 %v2278_v32  ;;  %1536 = vmatprep.subr.bf16.mxu1 %v2281_v33  ;;  %v2369_v32 = vld [vmem:[#allocation5 + $0x404] ss:$36 sps:$4 sm:$0xff]   ;;  %v2372_v33 = vld [vmem:[#allocation5 + $0x40c] ss:$36 sps:$4 sm:$0xff]  }
  0x84   :  { %1455 = vmatpush1.bf16.msra.mxu0 %v2276_v34  ;;  %1537 = vmatpush1.bf16.msra.mxu1 %v2279_v35  ;;  %v2367_v34 = vld [vmem:[#allocation5 + $0x400] ss:$36 sps:$4 sm:$0xff]   ;;  %v2370_v35 = vld [vmem:[#allocation5 + $0x408] ss:$36 sps:$4 sm:$0xff]  }
  0x85   :  { %1563 = vmatprep.subr.bf16.mxu0 %v2285_v36  ;;  %1645 = vmatprep.subr.bf16.mxu1 %v2288_v37  ;;  %v2375_v36 = vld [vmem:[#allocation5 + $0x44c] ss:$36 sps:$4 sm:$0xff]   ;;  %v2378_v37 = vld [vmem:[#allocation5 + $0x454] ss:$36 sps:$4 sm:$0xff]  }
  0x87   :  { %1473 = vmatmul.mubr.bf16.vlgmr.msra.gmra.mrb[0].mxu0 %v2592_v38  ;;  %1555 = vmatmul.mubr.bf16.vlgmr.msra.gmra.mrb[0].mxu1 %v2592_v38 }
  0x88   :  { %1564 = vmatpush1.bf16.msra.mxu0 %v2283_v39  ;;  %1646 = vmatpush1.bf16.msra.mxu1 %v2286_v40  ;;  %v2373_v39 = vld [vmem:[#allocation5 + $0x448] ss:$36 sps:$4 sm:$0xff]   ;;  %v2376_v40 = vld [vmem:[#allocation5 + $0x450] ss:$36 sps:$4 sm:$0xff]  }
  0x89   :  { %1565 = vmatprep.subr.bf16.mxu0 %v2291_v41  ;;  %1647 = vmatprep.subr.bf16.mxu1 %v2294_v42  ;;  %v2381_v41 = vld [vmem:[#allocation5 + $0x494] ss:$36 sps:$4 sm:$0xff]   ;;  %v2384_v42 = vld [vmem:[#allocation5 + $0x49c] ss:$36 sps:$4 sm:$0xff]  }
  0x8a   :  { %1595 = vmatprep.mubr.bf16.mxu0 %v2582_v48  ;;  %1677 = vmatprep.mubr.bf16.mxu1 %v2582_v48 }
  0x8c   :  { %1566 = vmatpush1.bf16.msra.mxu0 %v2289_v43  ;;  %1648 = vmatpush1.bf16.msra.mxu1 %v2292_v44  ;;  %v2379_v43 = vld [vmem:[#allocation5 + $0x490] ss:$36 sps:$4 sm:$0xff]   ;;  %v2382_v44 = vld [vmem:[#allocation5 + $0x498] ss:$36 sps:$4 sm:$0xff]  }
  0x8d   :  { %1567 = vmatprep.subr.bf16.mxu0 %v2297_v45  ;;  %1649 = vmatprep.subr.bf16.mxu1 %v2300_v46  ;;  %v2387_v45 = vld [vmem:[#allocation5 + $0x4dc] ss:$36 sps:$4 sm:$0xff]   ;;  %v2390_v46 = vld [vmem:[#allocation5 + $0x4e4] ss:$36 sps:$4 sm:$0xff]  }
  0x90   :  { %1568 = vmatpush1.bf16.msra.mxu0 %v2295_v47  ;;  %1650 = vmatpush1.bf16.msra.mxu1 %v2298_v49  ;;  %v2385_v47 = vld [vmem:[#allocation5 + $0x4d8] ss:$36 sps:$4 sm:$0xff]   ;;  %v2388_v49 = vld [vmem:[#allocation5 + $0x4e0] ss:$36 sps:$4 sm:$0xff]  }
  0x91   :  { %1569 = vmatprep.subr.bf16.mxu0 %v2303_v50  ;;  %1651 = vmatprep.subr.bf16.mxu1 %v2306_v51  ;;  %v2393_v50 = vld [vmem:[#allocation5 + $0x524] ss:$36 sps:$4 sm:$0xff]   ;;  %v2396_v51 = vld [vmem:[#allocation5 + $0x52c] ss:$36 sps:$4 sm:$0xff]  }
  0x94   :  { %1570 = vmatpush1.bf16.msra.mxu0 %v2301_v52  ;;  %1652 = vmatpush1.bf16.msra.mxu1 %v2304_v53  ;;  %v2391_v52 = vld [vmem:[#allocation5 + $0x520] ss:$36 sps:$4 sm:$0xff]   ;;  %v2394_v53 = vld [vmem:[#allocation5 + $0x528] ss:$36 sps:$4 sm:$0xff]  }
  0x95   :  { %1571 = vmatprep.subr.bf16.mxu0 %v2309_v54  ;;  %1653 = vmatprep.subr.bf16.mxu1 %v2312_v55  ;;  %v2399_v54 = vld [vmem:[#allocation5 + $0x56c] ss:$36 sps:$4 sm:$0xff]   ;;  %v2402_v55 = vld [vmem:[#allocation5 + $0x574] ss:$36 sps:$4 sm:$0xff]  }
  0x98   :  { %1572 = vmatpush1.bf16.msra.mxu0 %v2307_v56  ;;  %1654 = vmatpush1.bf16.msra.mxu1 %v2310_v57  ;;  %v2397_v56 = vld [vmem:[#allocation5 + $0x568] ss:$36 sps:$4 sm:$0xff]   ;;  %v2400_v57 = vld [vmem:[#allocation5 + $0x570] ss:$36 sps:$4 sm:$0xff]  }
  0x99   :  { %1573 = vmatprep.subr.bf16.mxu0 %v2315_v58  ;;  %1655 = vmatprep.subr.bf16.mxu1 %v2318_v59  ;;  %v2405_v58 = vld [vmem:[#allocation5 + $0x5b4] ss:$36 sps:$4 sm:$0xff]   ;;  %v2408_v59 = vld [vmem:[#allocation5 + $0x5bc] ss:$36 sps:$4 sm:$0xff]  }
  0x9c   :  { %1574 = vmatpush1.bf16.msra.mxu0 %v2313_v60  ;;  %1656 = vmatpush1.bf16.msra.mxu1 %v2316_v61  ;;  %v2403_v60 = vld [vmem:[#allocation5 + $0x5b0] ss:$36 sps:$4 sm:$0xff]   ;;  %v2411_v61 = vld [vmem:[#allocation5 + $0x5fc] ss:$36 sps:$4 sm:$0xff]  }
  0x9d   :  { %1575 = vmatprep.subr.bf16.mxu0 %v2321_v62  ;;  %1657 = vmatprep.subr.bf16.mxu1 %v2324_v63  ;;  %v2414_v62 = vld [vmem:[#allocation5 + $0x604] ss:$36 sps:$4 sm:$0xff]   ;;  %v2409_v63 = vld [vmem:[#allocation5 + $0x5f8] ss:$36 sps:$4 sm:$0xff]  }
  0xa0   :  { %1576 = vmatpush1.bf16.msra.mxu0 %v2319_v0  ;;  %1658 = vmatpush1.bf16.msra.mxu1 %v2322_v1  ;;  %v2412_v0 = vld [vmem:[#allocation5 + $0x600] ss:$36 sps:$4 sm:$0xff]  }
  0xa1   :  { %1577 = vmatprep.subr.bf16.mxu0 %v2327_v2  ;;  %1659 = vmatprep.subr.bf16.mxu1 %v2330_v3  ;;  %v2417_v1 = vld [vmem:[#allocation5 + $0x644] ss:$36 sps:$4 sm:$0xff]   ;;  %v2420_v2 = vld [vmem:[#allocation5 + $0x64c] ss:$36 sps:$4 sm:$0xff]  }
  0xa2   :  { %v2415_v3 = vld [vmem:[#allocation5 + $0x640] ss:$36 sps:$4 sm:$0xff]  }
  0xa4   :  { %1578 = vmatpush1.bf16.msra.mxu0 %v2325_v4  ;;  %1660 = vmatpush1.bf16.msra.mxu1 %v2328_v6  ;;  %v2418_v4 = vld [vmem:[#allocation5 + $0x648] ss:$36 sps:$4 sm:$0xff]  }
  0xa5   :  { %1579 = vmatprep.subr.bf16.mxu0 %v2333_v7  ;;  %1661 = vmatprep.subr.bf16.mxu1 %v2336_v8  ;;  %v2423_v6 = vld [vmem:[#allocation5 + $0x68c] ss:$36 sps:$4 sm:$0xff]   ;;  %v2426_v7 = vld [vmem:[#allocation5 + $0x694] ss:$36 sps:$4 sm:$0xff]  }
  0xa6   :  { %v2421_v8 = vld [vmem:[#allocation5 + $0x688] ss:$36 sps:$4 sm:$0xff]  }
  0xa8   :  { %1580 = vmatpush1.bf16.msra.mxu0 %v2331_v9  ;;  %1662 = vmatpush1.bf16.msra.mxu1 %v2334_v10  ;;  %v2424_v9 = vld [vmem:[#allocation5 + $0x690] ss:$36 sps:$4 sm:$0xff]   ;;  %v2427_v10 = vld [vmem:[#allocation5 + $0x260] ss:$36 sps:$4 sm:$0xff]  }
  0xa9   :  { %1581 = vmatprep.subr.bf16.mxu0 %v2339_v11  ;;  %1663 = vmatprep.subr.bf16.mxu1 %v2342_v12  ;;  %v2428_v11 = vld [vmem:[#allocation5 + $0x20] ss:$36 sps:$4 sm:$0xff]  }
  0xaa   :  { %v2429_v12 = vld [vmem:[#allocation5 + $0x4a0] ss:$36 sps:$4 sm:$0xff]  }
  0xac   :  { %1582 = vmatpush1.bf16.msra.mxu0 %v2337_v14  ;;  %1664 = vmatpush1.bf16.msra.mxu1 %v2340_v15  ;;  %v2528_v14 = vmov 0.0   ;;  %v2430_v15 = vld [vmem:[#allocation5 + $0x2a8] ss:$36 sps:$4 sm:$0xff]  }
  0xad   :  { %1583 = vmatprep.subr.bf16.mxu0 %v2345_v16  ;;  %1665 = vmatprep.subr.bf16.mxu1 %v2348_v17  ;;  %v2431_v16 = vld [vmem:[#allocation5 + $0x68] ss:$36 sps:$4 sm:$0xff]  }
  0xae   :  { %v2432_v17 = vld [vmem:[#allocation5 + $0x4e8] ss:$36 sps:$4 sm:$0xff]  }
  0xb0   :  { %1584 = vmatpush1.bf16.msra.mxu0 %v2343_v18  ;;  %1666 = vmatpush1.bf16.msra.mxu1 %v2346_v19  ;;  %v2433_v18 = vld [vmem:[#allocation5 + $0x2f0] ss:$36 sps:$4 sm:$0xff]  }
  0xb1   :  { %1585 = vmatprep.subr.bf16.mxu0 %v2351_v20  ;;  %1667 = vmatprep.subr.bf16.mxu1 %v2354_v21  ;;  %v2434_v19 = vld [vmem:[#allocation5 + $0xb0] ss:$36 sps:$4 sm:$0xff]   ;;  %v2436_v21 = vld [vmem:[#allocation5 + $0x338] ss:$36 sps:$4 sm:$0xff]  }
  0xb2   :  { %v2435_v20 = vld [vmem:[#allocation5 + $0x530] ss:$36 sps:$4 sm:$0xff]  }
  0xb4   :  { %1586 = vmatpush1.bf16.msra.mxu0 %v2349_v22  ;;  %1668 = vmatpush1.bf16.msra.mxu1 %v2352_v23  ;;  %v2437_v22 = vld [vmem:[#allocation5 + $0xf8] ss:$36 sps:$4 sm:$0xff]  }
  0xb5   :  { %1587 = vmatprep.subr.bf16.mxu0 %v2357_v24  ;;  %1669 = vmatprep.subr.bf16.mxu1 %v2360_v25  ;;  %v2438_v23 = vld [vmem:[#allocation5 + $0x578] ss:$36 sps:$4 sm:$0xff]   ;;  %v2439_v24 = vld [vmem:[#allocation5 + $0x380] ss:$36 sps:$4 sm:$0xff]  }
  0xb6   :  { %v2440_v25 = vld [vmem:[#allocation5 + $0x140] ss:$36 sps:$4 sm:$0xff]  }
  0xb8   :  { %1588 = vmatpush1.bf16.msra.mxu0 %v2355_v26  ;;  %1670 = vmatpush1.bf16.msra.mxu1 %v2358_v27  ;;  %v2442_v26 = vld [vmem:[#allocation5 + $0x3c8] ss:$36 sps:$4 sm:$0xff]  }
  0xb9   :  { %1589 = vmatprep.subr.bf16.mxu0 %v2363_v28  ;;  %1671 = vmatprep.subr.bf16.mxu1 %v2366_v29  ;;  %v2443_v27 = vld [vmem:[#allocation5 + $0x188] ss:$36 sps:$4 sm:$0xff]   ;;  %v2445_v29 = vld [vmem:[#allocation5 + $0x410] ss:$36 sps:$4 sm:$0xff]  }
  0xba   :  { %v2444_v28 = vld [vmem:[#allocation5 + $0x608] ss:$36 sps:$4 sm:$0xff]  }
  0xbc   :  { %1590 = vmatpush1.bf16.msra.mxu0 %v2361_v30  ;;  %1672 = vmatpush1.bf16.msra.mxu1 %v2364_v31  ;;  %v2446_v30 = vld [vmem:[#allocation5 + $0x1d0] ss:$36 sps:$4 sm:$0xff]  }
  0xbd   :  { %1591 = vmatprep.subr.bf16.mxu0 %v2369_v32  ;;  %1673 = vmatprep.subr.bf16.mxu1 %v2372_v33  ;;  %v2447_v31 = vld [vmem:[#allocation5 + $0x650] ss:$36 sps:$4 sm:$0xff]   ;;  %v2448_v32 = vld [vmem:[#allocation5 + $0x458] ss:$36 sps:$4 sm:$0xff]  }
  0xbe   :  { %v2449_v33 = vld [vmem:[#allocation5 + $0x218] ss:$36 sps:$4 sm:$0xff]  }
  0xc0   :  { %1592 = vmatpush1.bf16.msra.mxu0 %v2367_v34  ;;  %1674 = vmatpush1.bf16.msra.mxu1 %v2370_v35  ;;  %v2450_v34 = vld [vmem:[#allocation5 + $0x698] ss:$36 sps:$4 sm:$0xff]  }
  0xc1   :  { %1593 = vmatprep.subr.bf16.mxu0 %v2375_v36  ;;  %1675 = vmatprep.subr.bf16.mxu1 %v2378_v37 }
  0xc4   :  { %1594 = vmatpush1.bf16.msra.mxu0 %v2373_v39  ;;  %1676 = vmatpush1.bf16.msra.mxu1 %v2376_v40 }
  0xc5   :  { %1604 = vmatprep.subr.bf16.mxu0 %v2381_v41  ;;  %1686 = vmatprep.subr.bf16.mxu1 %v2384_v42 }
  0xc7   :  { %1596 = vmatmul.mubr.bf16.vlgmr.msra.gmra.mrb[4].mxu0 %v2586_v5  ;;  %1678 = vmatmul.mubr.bf16.vlgmr.msra.gmra.mrb[4].mxu1 %v2586_v5 }
  0xc8   :  { %1605 = vmatpush1.bf16.msra.mxu0 %v2379_v43  ;;  %1687 = vmatpush1.bf16.msra.mxu1 %v2382_v44 }
  0xc9   :  { %1606 = vmatprep.subr.bf16.mxu0 %v2387_v45  ;;  %1688 = vmatprep.subr.bf16.mxu1 %v2390_v46 }
  0xca   :  { %1636 = vmatprep.mubr.bf16.mxu0 %v2527_v13  ;;  %1718 = vmatprep.mubr.bf16.mxu1 %v2527_v13  ;;  %v2406_v13 = vld [vmem:[#allocation5 + $0x5b8] ss:$36 sps:$4 sm:$0xff]  }
  0xcc   :  { %1607 = vmatpush1.bf16.msra.mxu0 %v2385_v47  ;;  %1689 = vmatpush1.bf16.msra.mxu1 %v2388_v49 }
  0xcd   :  { %1608 = vmatprep.subr.bf16.mxu0 %v2393_v50  ;;  %1690 = vmatprep.subr.bf16.mxu1 %v2396_v51 }
  0xd0   :  { %1609 = vmatpush1.bf16.msra.mxu0 %v2391_v52  ;;  %1691 = vmatpush1.bf16.msra.mxu1 %v2394_v53 }
  0xd1   :  { %1610 = vmatprep.subr.bf16.mxu0 %v2399_v54  ;;  %1692 = vmatprep.subr.bf16.mxu1 %v2402_v55 }
  0xd4   :  { %1611 = vmatpush1.bf16.msra.mxu0 %v2397_v56  ;;  %1693 = vmatpush1.bf16.msra.mxu1 %v2400_v57 }
  0xd5   :  { %1612 = vmatprep.subr.bf16.mxu0 %v2405_v58  ;;  %1694 = vmatprep.subr.bf16.mxu1 %v2408_v59 }
  0xd8   :  { %1613 = vmatpush1.bf16.msra.mxu0 %v2403_v60  ;;  %1695 = vmatpush1.bf16.msra.mxu1 %v2406_v13 }
  0xd9   :  { %1614 = vmatprep.subr.bf16.mxu0 %v2411_v61  ;;  %1696 = vmatprep.subr.bf16.mxu1 %v2414_v62 }
  0xdc   :  { %1615 = vmatpush1.bf16.msra.mxu0 %v2409_v63  ;;  %1697 = vmatpush1.bf16.msra.mxu1 %v2412_v0 }
  0xdd   :  { %1616 = vmatprep.subr.bf16.mxu0 %v2417_v1  ;;  %1698 = vmatprep.subr.bf16.mxu1 %v2420_v2 }
  0xe0   :  { %1617 = vmatpush1.bf16.msra.mxu0 %v2415_v3  ;;  %1699 = vmatpush1.bf16.msra.mxu1 %v2418_v4  ;;  %v2060_v3 = vld [vmem:[%s2624_s2] ss:$0 sm:$0xff] }
  0xe1   :  { %1618 = vmatprep.subr.bf16.mxu0 %v2423_v6  ;;  %1700 = vmatprep.subr.bf16.mxu1 %v2426_v7 }
  0xe4   :  { %1619 = vmatpush1.bf16.msra.mxu0 %v2421_v8  ;;  %1701 = vmatpush1.bf16.msra.mxu1 %v2424_v9 }
  0xe5   :  { %2061 = vmatprep.subr.bf16.mxu0 %v2427_v10  ;;  %2092 = vmatprep.subr.bf16.mxu1 %v2528_v14 }
  0xe7   :  { %1637 = vmatmul.mubr.bf16.vlgmr.msra.gmra.mrb[4].mxu0 %v2592_v38  ;;  %1719 = vmatmul.mubr.bf16.vlgmr.msra.gmra.mrb[4].mxu1 %v2592_v38 }
  0xe8   :  { %2062 = vmatpush3.bf16.msra.mxu0 %v2428_v11  ;;  %2093 = vmatpush3.bf16.msra.mxu1 %v2429_v12 }
  0xe9   :  { %2063 = vmatprep.subr.bf16.mxu0 %v2430_v15  ;;  %2094 = vmatprep.subr.bf16.mxu1 %v2528_v14 }
  0xea   :  { %1759 = vmatprep.mubr.bf16.mxu0 %v2582_v48  ;;  %2108 = vmatprep.mubr.msk.bf16.mxu1 %vm2529_vm0, %v2528_v14  ;;  %v2441_v48 = vld [vmem:[#allocation5 + $0x5c0] ss:$36 sps:$4 sm:$0xff]  }
  0xec   :  { %2064 = vmatpush3.bf16.msra.mxu0 %v2431_v16  ;;  %2095 = vmatpush3.bf16.msra.mxu1 %v2432_v17 }
  0xed   :  { %2065 = vmatprep.subr.bf16.mxu0 %v2433_v18  ;;  %2096 = vmatprep.subr.bf16.mxu1 %v2528_v14 }
  0xf0   :  { %2066 = vmatpush3.bf16.msra.mxu0 %v2434_v19  ;;  %2097 = vmatpush3.bf16.msra.mxu1 %v2435_v20 }
  0xf1   :  { %2067 = vmatprep.subr.bf16.mxu0 %v2436_v21  ;;  %2098 = vmatprep.subr.bf16.mxu1 %v2528_v14 }
  0xf4   :  { %2068 = vmatpush3.bf16.msra.mxu0 %v2437_v22  ;;  %2099 = vmatpush3.bf16.msra.mxu1 %v2438_v23 }
  0xf5   :  { %2069 = vmatprep.subr.bf16.mxu0 %v2439_v24  ;;  %2100 = vmatprep.subr.bf16.mxu1 %v2528_v14 }
  0xf8   :  { %2070 = vmatpush3.bf16.msra.mxu0 %v2440_v25  ;;  %2101 = vmatpush3.bf16.msra.mxu1 %v2441_v48 }
  0xf9   :  { %2071 = vmatprep.subr.bf16.mxu0 %v2442_v26  ;;  %2102 = vmatprep.subr.bf16.mxu1 %v2528_v14 }
  0xfc   :  { %2072 = vmatpush3.bf16.msra.mxu0 %v2443_v27  ;;  %2103 = vmatpush3.bf16.msra.mxu1 %v2444_v28 }
  0xfd   :  { %2073 = vmatprep.subr.bf16.mxu0 %v2445_v29  ;;  %2104 = vmatprep.subr.bf16.mxu1 %v2528_v14 }
 0x100   :  { %2074 = vmatpush3.bf16.msra.mxu0 %v2446_v30  ;;  %2105 = vmatpush3.bf16.msra.mxu1 %v2447_v31 }
 0x101   :  { %2075 = vmatprep.subr.bf16.mxu0 %v2448_v32  ;;  %2106 = vmatprep.subr.bf16.mxu1 %v2528_v14 }
 0x104   :  { %2076 = vmatpush3.bf16.msra.mxu0 %v2449_v33  ;;  %2107 = vmatpush3.bf16.msra.mxu1 %v2450_v34 }
 0x107   :  { %1760 = vmatmul.mubr.bf16.vlgmr.msra.gmra.mrb[8].mxu0 %v2586_v5  ;;  %2109 = vmatmul.mubr.bf16.vlgmr.msra.gmra.mrb[8].mxu1 %v2592_v38 }
 0x15a   :  { %v1474_v35 = vpop.f32.mrb[0].mxu0  ;;  %v1556_v36 = vpop.f32.mrb[0].mxu1 }
 0x15b   :  { %v1476_v37 = vpop.f32.mrb[1].mxu0  ;;  %v1558_v39 = vpop.f32.mrb[1].mxu1 }
 0x15c   :  { %v1807_v40 = vmax.f32 %v1474_v35, %v1476_v37  ;;  %v1478_v41 = vpop.f32.mrb[2].mxu0  ;;  %v1560_v42 = vpop.f32.mrb[2].mxu1 }
 0x15d   :  { %v1479_v43 = vpop.f32.mrb[3].mxu0  ;;  %v1561_v44 = vpop.f32.mrb[3].mxu1 }
 0x15e   :  { %v1808_v45 = vmax.f32 %v1807_v40, %v1556_v36 }
 0x160   :  { %v1809_v46 = vmax.f32 %v1808_v45, %v1558_v39 }
 0x1ba   :  { %v1638_v47 = vpop.f32.mrb[4].mxu0  ;;  %v1720_v49 = vpop.f32.mrb[4].mxu1 }
 0x1bb   :  { %v1810_v50 = vmax.f32 %v1809_v46, %v1638_v47  ;;  %v1640_v51 = vpop.f32.mrb[5].mxu0  ;;  %v1722_v52 = vpop.f32.mrb[5].mxu1 }
 0x1bc   :  { %v1642_v53 = vpop.f32.mrb[6].mxu0  ;;  %v1724_v5 = vpop.f32.mrb[6].mxu1 }
 0x1bd   :  { %v1811_v54 = vmax.f32 %v1810_v50, %v1640_v51  ;;  %v1643_v38 = vpop.f32.mrb[7].mxu0  ;;  %v1725_v55 = vpop.f32.mrb[7].mxu1 }
 0x1bf   :  { %v1812_v56 = vmax.f32 %v1811_v54, %v1720_v49 }
 0x1c1   :  { %v1813_v57 = vmax.f32 %v1812_v56, %v1722_v52 }
 0x1da   :  { %v2077_v58 = vpop.f32.mrb[8].mxu0  ;;  %v1801_v59 = vpop.f32.mrb[8].mxu1 }
 0x1db   :  { %v2078_v60 = vpop.f32.mrb[9].mxu0  ;;  %v2110_v13 = vpop.f32.mrb[9].mxu1 }
 0x1dc   :  { %v2079_v61 = vadd.f32 %v2078_v60, %v2077_v58  ;;  %v2080_v62 = vpop.f32.mrb[10].mxu0  ;;  %v1804_v63 = vpop.f32.mrb[10].mxu1 }
 0x1dd   :  { %v2081_v0 = vpop.f32.mrb[11].mxu0  ;;  %v2111_v1 = vpop.f32.mrb[11].mxu1 }
 0x1de   :  { %v1802_v2 = vadd.f32 %v2079_v61, %v1801_v59 }
 0x1e0   :  { %v1814_v4 = vmax.f32 %v1813_v57, %v1802_v2 }
 0x1e2   :  { %v1822_v6 = vadd.f32 %v2060_v3, %v1814_v4 }
 0x1e4   :  { %v1823_v7 = vmax.f32 %v1822_v6, 0.0 }
 0x1e6   :  { %1824 = vst [vmem:[#allocation7] sm:$0xff] %v1823_v7 }
 0x1e7   :  { %2506 = shalt.err (!%p2503_p6)
}
 0x1e8   :  { %s2507_s16 = scalar_lea.hbm %s2625_s3, 128 }
 0x1e9   :  { %p2508_p7 = scmp.ne.s32.totalorder %s2625_s3, %s2507_s16  ;;  %p2511_p8 = scmp.lt.u32.totalorder %s2507_s16, %s2625_s3 }
 0x1eb   :  { %p2513_p9 = pnand %p2511_p8, %p2508_p7 }
 0x1ed   :  { %2516 = shalt.err (!%p2513_p9)
}
 0x1ee   :  { %1834 = dma.vmem_to_hbm [thread:$0]  %s1832_s12, 128, %s2625_s3, [#allocation4]  }
 0x1ef   :  { %2521 = dma.done.wait [#allocation4], 128  }
 0x1f0   :  { %2522 = vsyncadd [#allocation4], 4294967168 }
 0x1f1   :  { %1838 = vsyncpa [#allocation3], 1 }
 0x1f2   :  { %1839 = vsyncpa [#allocation6], 1 }
 0x1f3   :  { %1840 = vsyncpa [#allocation4], 1 }

</bundles_post_ra>
